<compile_context>
chip_gen: v7x
topology: tpu7x:2x2x1
jax: 0.10.0
libtpu: 0.0.40
codegen_flags: <defaults>
</compile_context>

<pallas_src>
import functools

import jax
import jax.numpy as jnp
from jax import lax
from jax.experimental import pallas as pl
from jax.experimental.pallas import tpu as pltpu


def _round_up(x, m):
    return ((x + m - 1) // m) * m


def head_layer_kernel(x_ref, w1_ref, b1_ref, w2_ref, b2_ref, g_ref, beta_ref,
                      o_ref, acc_ref, *, d_valid, eps):
    j = pl.program_id(1)

    @pl.when(j == 0)
    def _():
        acc_ref[...] = jnp.zeros_like(acc_ref)

    # Linear1 (this H-slice) + ReLU.  Dropout = identity (eval mode).
    # bf16 operands on the MXU, f32 accumulation.
    h = jnp.dot(x_ref[...], w1_ref[...], preferred_element_type=jnp.float32)
    h = jnp.maximum(h + b1_ref[...], 0.0)

    # Partial Linear2: contract this H-slice against its W2 slice.
    acc_ref[...] += jnp.dot(h.astype(jnp.bfloat16), w2_ref[...],
                            preferred_element_type=jnp.float32)

    @pl.when(j == pl.num_programs(1) - 1)
    def _():
        y = acc_ref[...] + b2_ref[...]
        d_pad = y.shape[-1]
        if d_valid == d_pad:
            mean = jnp.mean(y, axis=-1, keepdims=True)
            centered = y - mean
        else:
            # Padded columns of y are exactly zero (zero-padded W2 cols / b2),
            # so sum over the padded width equals the sum over real columns.
            mean = jnp.sum(y, axis=-1, keepdims=True) / d_valid
            col = lax.broadcasted_iota(jnp.int32, y.shape, 1)
            centered = jnp.where(col < d_valid, y - mean, 0.0)
        var = jnp.sum(centered * centered, axis=-1, keepdims=True) / d_valid
        out = centered * lax.rsqrt(var + eps) * g_ref[...] + beta_ref[...]
        o_ref[...] = out.astype(o_ref.dtype)


def head_layer(x2d, w1, b1, w2, b2, gamma, beta, *,
               tile_m=256, tile_h=512, eps=1e-5):
    """x2d: (M, D).  w1: (D, H), b1: (H,), w2: (H, D), b2: (D,), gamma/beta: (D,)."""
    M, D = x2d.shape
    H = w1.shape[1]

    # Lane-dense padding: last dims to multiples of 128 (unmasked vst, full
    # MXU contraction depth).
    D_pad = _round_up(D, 128)
    H_pad = _round_up(H, 128)

    # Row tile: as large as the problem allows (multiple of 16 so bf16 x-tiles
    # stay sublane-aligned).  With realistic M this yields many "parallel"
    # grid steps, which also shards across v7x's two TensorCores.
    tile_m = min(tile_m, _round_up(M, 16))
    M_pad = _round_up(M, tile_m)

    # Hidden tile: inner reduction axis.
    tile_h = min(tile_h, H_pad)
    H_pad = _round_up(H_pad, tile_h)

    # bf16 matmul operands (f32 accumulation happens inside the kernel).
    xp = jnp.pad(x2d.astype(jnp.bfloat16), ((0, M_pad - M), (0, D_pad - D)))
    w1p = jnp.pad(w1.astype(jnp.bfloat16), ((0, D_pad - D), (0, H_pad - H)))
    w2p = jnp.pad(w2.astype(jnp.bfloat16), ((0, H_pad - H), (0, D_pad - D)))
    b1p = jnp.pad(b1.astype(jnp.float32), (0, H_pad - H)).reshape(1, H_pad)
    b2p = jnp.pad(b2.astype(jnp.float32), (0, D_pad - D)).reshape(1, D_pad)
    gp = jnp.pad(gamma.astype(jnp.float32), (0, D_pad - D)).reshape(1, D_pad)
    bp = jnp.pad(beta.astype(jnp.float32), (0, D_pad - D)).reshape(1, D_pad)

    grid = (M_pad // tile_m, H_pad // tile_h)
    kernel = functools.partial(head_layer_kernel, d_valid=D, eps=eps)

    out = pl.pallas_call(
        kernel,
        out_shape=jax.ShapeDtypeStruct((M_pad, D_pad), x2d.dtype),
        grid_spec=pltpu.PrefetchScalarGridSpec(
            num_scalar_prefetch=0,
            grid=grid,
            in_specs=[
                pl.BlockSpec((tile_m, D_pad), lambda i, j: (i, 0)),   # x tile
                pl.BlockSpec((D_pad, tile_h), lambda i, j: (0, j)),   # W1 slice
                pl.BlockSpec((1, tile_h), lambda i, j: (0, j)),       # b1 slice
                pl.BlockSpec((tile_h, D_pad), lambda i, j: (j, 0)),   # W2 slice
                pl.BlockSpec((1, D_pad), lambda i, j: (0, 0)),        # b2
                pl.BlockSpec((1, D_pad), lambda i, j: (0, 0)),        # gamma
                pl.BlockSpec((1, D_pad), lambda i, j: (0, 0)),        # beta
            ],
            out_specs=pl.BlockSpec((tile_m, D_pad), lambda i, j: (i, 0)),
            scratch_shapes=[pltpu.VMEM((tile_m, D_pad), jnp.float32)],
        ),
        compiler_params=pltpu.CompilerParams(
            dimension_semantics=("parallel", "arbitrary"),
            vmem_limit_bytes=48 * 1024 * 1024,
        ),
    )(xp, w1p, b1p, w2p, b2p, gp, bp)

    return out[:M, :D]


def head_layer_ref(x2d, w1, b1, w2, b2, gamma, beta):
    h = jnp.maximum(x2d @ w1 + b1, 0.0)
    y = h @ w2 + b2
    mean = jnp.mean(y, axis=-1, keepdims=True)
    var = jnp.mean(jnp.square(y - mean), axis=-1, keepdims=True)
    return (y - mean) / jnp.sqrt(var + 1e-5) * gamma + beta


if __name__ == "__main__":
    # Small shapes consistent with the module: d_model=32, extend=4.
    batch, seq, d_model, extend = 2, 8, 32, 4
    hidden = extend * d_model

    key = jax.random.PRNGKey(0)
    kx, k1, k2, k3, k4 = jax.random.split(key, 5)

    x = jax.random.normal(kx, (batch, seq, d_model), dtype=jnp.float32)

    # Deterministic parameter init (PyTorch Linear-style uniform bounds).
    bound1 = 1.0 / (d_model ** 0.5)
    bound2 = 1.0 / (hidden ** 0.5)
    w1 = jax.random.uniform(k1, (d_model, hidden), jnp.float32, -bound1, bound1)
    b1 = jax.random.uniform(k2, (hidden,), jnp.float32, -bound1, bound1)
    w2 = jax.random.uniform(k3, (hidden, d_model), jnp.float32, -bound2, bound2)
    b2 = jax.random.uniform(k4, (d_model,), jnp.float32, -bound2, bound2)
    gamma = jnp.ones((d_model,), jnp.float32)   # LayerNorm weight init
    beta = jnp.zeros((d_model,), jnp.float32)   # LayerNorm bias init

    x2d = x.reshape(batch * seq, d_model)
    out2d = head_layer(x2d, w1, b1, w2, b2, gamma, beta)
    out = out2d.reshape(batch, seq, d_model)
    jax.block_until_ready(out)

    ref = head_layer_ref(x2d, w1, b1, w2, b2, gamma, beta).reshape(
        batch, seq, d_model)
    # bf16 MXU operands cost ~2 decimal digits vs the pure-f32 reference.
    assert jnp.allclose(out, ref, atol=5e-2, rtol=5e-2), "mismatch vs reference"

    print("KERNEL_OK")
</pallas_src>

<mosaic_0001>
module attributes {stable_mosaic.version = 11 : i64} {
  func.func @head_layer_kernel(%arg0: i32, %arg1: i32, %arg2: memref<16x128xbf16, #tpu.memory_space<vmem>>, %arg3: memref<128x128xbf16, #tpu.memory_space<vmem>>, %arg4: memref<1x128xf32, #tpu.memory_space<vmem>>, %arg5: memref<128x128xbf16, #tpu.memory_space<vmem>>, %arg6: memref<1x128xf32, #tpu.memory_space<vmem>>, %arg7: memref<1x128xf32, #tpu.memory_space<vmem>>, %arg8: memref<1x128xf32, #tpu.memory_space<vmem>>, %arg9: memref<16x128xf32, #tpu.memory_space<vmem>>, %arg10: memref<16x128xf32, #tpu.memory_space<vmem>>) attributes {dimension_semantics = [#tpu.dimension_semantics<parallel>, #tpu.dimension_semantics<arbitrary>], iteration_bounds = array<i64: 1, 1>, scalar_prefetch = 0 : i64, scratch_operands = 1 : i64, tpu.core_type = #tpu.core_type<tc>, window_params = [{transform_indices = @transform_0, window_bounds = array<i64: 16, 128>}, {transform_indices = @transform_1, window_bounds = array<i64: 128, 128>}, {transform_indices = @transform_2, window_bounds = array<i64: 1, 128>}, {transform_indices = @transform_3, window_bounds = array<i64: 128, 128>}, {pipeline_mode = #tpu.pipeline_mode<synchronous>, transform_indices = @transform_4, window_bounds = array<i64: 1, 128>}, {pipeline_mode = #tpu.pipeline_mode<synchronous>, transform_indices = @transform_5, window_bounds = array<i64: 1, 128>}, {pipeline_mode = #tpu.pipeline_mode<synchronous>, transform_indices = @transform_6, window_bounds = array<i64: 1, 128>}, {transform_indices = @transform_7, window_bounds = array<i64: 16, 128>}]} {
    %c0_i32 = arith.constant 0 : i32
    %0 = arith.cmpi eq, %arg1, %c0_i32 : i32
    %1 = arith.extui %0 : i1 to i32
    %c0_i32_0 = arith.constant 0 : i32
    %2 = arith.cmpi ne, %1, %c0_i32_0 : i32
    scf.if %2 {
      %cst_16 = arith.constant 0.000000e+00 : f32
      %20 = vector.broadcast %cst_16 : f32 to vector<16x128xf32>
      %c0_17 = arith.constant 0 : index
      %c0_18 = arith.constant 0 : index
      %21 = vector.load %arg10[%c0_17, %c0_18] : memref<16x128xf32, #tpu.memory_space<vmem>>, vector<16x128xf32>
      tpu.vector_store %arg10[%c0_17, %c0_18], %20 {strides = array<i32>} : memref<16x128xf32, #tpu.memory_space<vmem>>, vector<16x128xf32>,
    } else {
    }
    %c0 = arith.constant 0 : index
    %c0_1 = arith.constant 0 : index
    %3 = vector.load %arg2[%c0, %c0_1] : memref<16x128xbf16, #tpu.memory_space<vmem>>, vector<16x128xbf16>
    %c0_2 = arith.constant 0 : index
    %c0_3 = arith.constant 0 : index
    %4 = vector.load %arg3[%c0_2, %c0_3] : memref<128x128xbf16, #tpu.memory_space<vmem>>, vector<128x128xbf16>
    %cst = arith.constant dense<0.000000e+00> : vector<16x128xf32>
    %5 = tpu.matmul %3, %4, %cst {dimension_numbers = #tpu.dot_dimension_numbers<[1], [0], [0], [1], [0, 0, 1, 1], [], []>} : vector<16x128xbf16>, vector<128x128xbf16>, vector<16x128xf32> -> vector<16x128xf32>
    %c0_4 = arith.constant 0 : index
    %c0_5 = arith.constant 0 : index
    %6 = vector.load %arg4[%c0_4, %c0_5] : memref<1x128xf32, #tpu.memory_space<vmem>>, vector<1x128xf32>
    %7 = vector.broadcast %6 : vector<1x128xf32> to vector<16x128xf32>
    %8 = arith.addf %5, %7 : vector<16x128xf32>
    %cst_6 = arith.constant 0.000000e+00 : f32
    %9 = vector.broadcast %cst_6 : f32 to vector<16x128xf32>
    %10 = arith.maximumf %8, %9 : vector<16x128xf32>
    %c0_7 = arith.constant 0 : index
    %c0_8 = arith.constant 0 : index
    %11 = vector.load %arg10[%c0_7, %c0_8] : memref<16x128xf32, #tpu.memory_space<vmem>>, vector<16x128xf32>
    %12 = arith.truncf %10 : vector<16x128xf32> to vector<16x128xbf16>
    %c0_9 = arith.constant 0 : index
    %c0_10 = arith.constant 0 : index
    %13 = vector.load %arg5[%c0_9, %c0_10] : memref<128x128xbf16, #tpu.memory_space<vmem>>, vector<128x128xbf16>
    %cst_11 = arith.constant dense<0.000000e+00> : vector<16x128xf32>
    %14 = tpu.matmul %12, %13, %cst_11 {dimension_numbers = #tpu.dot_dimension_numbers<[1], [0], [0], [1], [0, 0, 1, 1], [], []>} : vector<16x128xbf16>, vector<128x128xbf16>, vector<16x128xf32> -> vector<16x128xf32>
    %15 = arith.addf %11, %14 : vector<16x128xf32>
    %c0_12 = arith.constant 0 : index
    %c0_13 = arith.constant 0 : index
    %16 = vector.load %arg10[%c0_12, %c0_13] : memref<16x128xf32, #tpu.memory_space<vmem>>, vector<16x128xf32>
    tpu.vector_store %arg10[%c0_12, %c0_13], %15 {strides = array<i32>} : memref<16x128xf32, #tpu.memory_space<vmem>>, vector<16x128xf32>,
    %c0_i32_14 = arith.constant 0 : i32
    %17 = arith.cmpi eq, %arg1, %c0_i32_14 : i32
    %18 = arith.extui %17 : i1 to i32
    %c0_i32_15 = arith.constant 0 : i32
    %19 = arith.cmpi ne, %18, %c0_i32_15 : i32
    scf.if %19 {
      %c0_16 = arith.constant 0 : index
      %c0_17 = arith.constant 0 : index
      %20 = vector.load %arg10[%c0_16, %c0_17] : memref<16x128xf32, #tpu.memory_space<vmem>>, vector<16x128xf32>
      %c0_18 = arith.constant 0 : index
      %c0_19 = arith.constant 0 : index
      %21 = vector.load %arg6[%c0_18, %c0_19] : memref<1x128xf32, #tpu.memory_space<vmem>>, vector<1x128xf32>
      %22 = vector.broadcast %21 : vector<1x128xf32> to vector<16x128xf32>
      %23 = arith.addf %20, %22 : vector<16x128xf32>
      %cst_20 = arith.constant dense<0.000000e+00> : vector<16xf32>
      %24 = vector.multi_reduction <add>, %23, %cst_20 [1] : vector<16x128xf32> to vector<16xf32>
      %25 = vector.shape_cast %24 : vector<16xf32> to vector<16x1xf32>
      %cst_21 = arith.constant 3.200000e+01 : f32
      %26 = vector.broadcast %cst_21 : f32 to vector<16x1xf32>
      %27 = arith.divf %25, %26 : vector<16x1xf32>
      %28 = tpu.iota {dimensions = array<i32: 1>} : vector<16x128xi32>
      %c32_i32 = arith.constant 32 : i32
      %29 = vector.broadcast %c32_i32 : i32 to vector<16x128xi32>
      %30 = arith.cmpi slt, %28, %29 : vector<16x128xi32>
      %31 = vector.broadcast %27 : vector<16x1xf32> to vector<16x128xf32>
      %32 = arith.subf %23, %31 : vector<16x128xf32>
      %cst_22 = arith.constant 0.000000e+00 : f32
      %33 = vector.broadcast %cst_22 : f32 to vector<16x128xf32>
      %34 = arith.select %30, %32, %33 : vector<16x128xi1>, vector<16x128xf32>
      %35 = arith.mulf %34, %34 : vector<16x128xf32>
      %cst_23 = arith.constant dense<0.000000e+00> : vector<16xf32>
      %36 = vector.multi_reduction <add>, %35, %cst_23 [1] : vector<16x128xf32> to vector<16xf32>
      %37 = vector.shape_cast %36 : vector<16xf32> to vector<16x1xf32>
      %cst_24 = arith.constant 3.200000e+01 : f32
      %38 = vector.broadcast %cst_24 : f32 to vector<16x1xf32>
      %39 = arith.divf %37, %38 : vector<16x1xf32>
      %cst_25 = arith.constant 9.99999974E-6 : f32
      %40 = vector.broadcast %cst_25 : f32 to vector<16x1xf32>
      %41 = arith.addf %39, %40 : vector<16x1xf32>
      %42 = math.rsqrt %41 : vector<16x1xf32>
      %43 = vector.broadcast %42 : vector<16x1xf32> to vector<16x128xf32>
      %44 = arith.mulf %34, %43 : vector<16x128xf32>
      %c0_26 = arith.constant 0 : index
      %c0_27 = arith.constant 0 : index
      %45 = vector.load %arg7[%c0_26, %c0_27] : memref<1x128xf32, #tpu.memory_space<vmem>>, vector<1x128xf32>
      %46 = vector.broadcast %45 : vector<1x128xf32> to vector<16x128xf32>
      %47 = arith.mulf %44, %46 : vector<16x128xf32>
      %c0_28 = arith.constant 0 : index
      %c0_29 = arith.constant 0 : index
      %48 = vector.load %arg8[%c0_28, %c0_29] : memref<1x128xf32, #tpu.memory_space<vmem>>, vector<1x128xf32>
      %49 = vector.broadcast %48 : vector<1x128xf32> to vector<16x128xf32>
      %50 = arith.addf %47, %49 : vector<16x128xf32>
      %c0_30 = arith.constant 0 : index
      %c0_31 = arith.constant 0 : index
      %51 = vector.load %arg9[%c0_30, %c0_31] : memref<16x128xf32, #tpu.memory_space<vmem>>, vector<16x128xf32>
      tpu.vector_store %arg9[%c0_30, %c0_31], %50 {strides = array<i32>} : memref<16x128xf32, #tpu.memory_space<vmem>>, vector<16x128xf32>,
    } else {
    }
    return
  }
  func.func @transform_0(%arg0: i32, %arg1: i32) -> (i32, i32) {
    %c0_i32 = arith.constant 0 : i32
    %c0_i32_0 = arith.constant 0 : i32
    return %arg0, %c0_i32 : i32, i32
  }
  func.func @transform_1(%arg0: i32, %arg1: i32) -> (i32, i32) {
    %c0_i32 = arith.constant 0 : i32
    %c0_i32_0 = arith.constant 0 : i32
    return %c0_i32, %arg1 : i32, i32
  }
  func.func @transform_2(%arg0: i32, %arg1: i32) -> (i32, i32) {
    %c0_i32 = arith.constant 0 : i32
    %c0_i32_0 = arith.constant 0 : i32
    return %c0_i32, %arg1 : i32, i32
  }
  func.func @transform_3(%arg0: i32, %arg1: i32) -> (i32, i32) {
    %c0_i32 = arith.constant 0 : i32
    %c0_i32_0 = arith.constant 0 : i32
    return %arg1, %c0_i32 : i32, i32
  }
  func.func @transform_4(%arg0: i32, %arg1: i32) -> (i32, i32) {
    %c0_i32 = arith.constant 0 : i32
    %c0_i32_0 = arith.constant 0 : i32
    %c0_i32_1 = arith.constant 0 : i32
    return %c0_i32, %c0_i32_0 : i32, i32
  }
  func.func @transform_5(%arg0: i32, %arg1: i32) -> (i32, i32) {
    %c0_i32 = arith.constant 0 : i32
    %c0_i32_0 = arith.constant 0 : i32
    %c0_i32_1 = arith.constant 0 : i32
    return %c0_i32, %c0_i32_0 : i32, i32
  }
  func.func @transform_6(%arg0: i32, %arg1: i32) -> (i32, i32) {
    %c0_i32 = arith.constant 0 : i32
    %c0_i32_0 = arith.constant 0 : i32
    %c0_i32_1 = arith.constant 0 : i32
    return %c0_i32, %c0_i32_0 : i32, i32
  }
  func.func @transform_7(%arg0: i32, %arg1: i32) -> (i32, i32) {
    %c0_i32 = arith.constant 0 : i32
    %c0_i32_0 = arith.constant 0 : i32
    return %arg0, %c0_i32 : i32, i32
  }
}

</mosaic_0001>

<bundles_post_ra>
// kernel: tpu_custom_call.1
= control target key start
LH: loop header
LB: loop body
LE: loop exit
PB: predicated region body
PF: predicated region fallthrough
CT: control target
= control target key end

     0   :  { %12 = vsyncpa [#allocation4], 0  ;;  %s719_s0 = inlined_call_operand.hbm [shape: bf16[16,128], index: 0, kind: input, shape index: {}]   ;;  %s720_s1 = inlined_call_operand.hbm [shape: bf16[128,128], index: 1, kind: input, shape index: {}]   ;;  %s721_s2 = inlined_call_operand.vmem [shape: f32[1,128], index: 2, kind: input, shape index: {}]   ;;  %s722_s3 = inlined_call_operand.hbm [shape: bf16[128,128], index: 3, kind: input, shape index: {}]   ;;  %s723_s4 = inlined_call_operand.vmem [shape: f32[1,128], index: 4, kind: input, shape index: {}]   ;;  %s724_s5 = inlined_call_operand.vmem [shape: f32[1,128], index: 5, kind: input, shape index: {}]   ;;  %s725_s6 = inlined_call_operand.vmem [shape: f32[1,128], index: 6, kind: input, shape index: {}]   ;;  %s726_s7 = inlined_call_operand.hbm [shape: f32[16,128], index: 7, kind: output, shape index: {}]  }
   0x1   :  { %13 = vsyncpa [#allocation7], 0 }
   0x2   :  { %14 = vsyncpa [#allocation5], 0  ;;  %s593_s24 = smov [#allocation6]   ;;  %s594_s26 = smov [#allocation3]  }
   0x3   :  { %s32_s25 = sshll.u32 %s593_s24, 4  ;;  %s20_s27 = sshll.u32 %s594_s26, 4  ;;  %s33_s25 = int_to_ptr.vmem [resolvable:$true] %s32_s25  ;;  %s643_s27 = int_to_ptr.vmem [resolvable:$true] %s20_s27 }
   0x4   :  { %s499_s30 = scalar_lea.hbm %s720_s1, 1024 }
   0x5   :  { %p500_p0 = scmp.ne.s32.totalorder %s720_s1, %s499_s30  ;;  %p503_p1 = scmp.lt.u32.totalorder %s499_s30, %s720_s1 }
   0x7   :  { %p505_p2 = pnand %p503_p1, %p500_p0 }
   0x9   :  { %508 = shalt.err (!%p505_p2)
}
   0xa   :  { %s509_s12 = scalar_lea.vmem %s33_s25, 1024  ;;  %p514_p4 = scmp.lt.s32.totalorder %s33_s25, %s33_s25 }
   0xb   :  { %p510_p3 = scmp.ne.s32.totalorder %s33_s25, %s509_s12  ;;  %p515_p5 = scmp.lt.s32.totalorder %s509_s12, %s509_s12 }
   0xd   :  { %p516_p6 = por %p515_p5, %p514_p4 }
   0xf   :  { %p517_p7 = pnand %p516_p6, %p510_p3 }
  0x11   :  { %520 = shalt.err (!%p517_p7)
}
  0x12   :  { %s595_s13 = smov 64   ;;  %s596_s14 = smov 4  }
  0x13   :  { %38 = dma.hbm_to_vmem [thread:$0]  %s720_s1, 1024, %s33_s25, [#allocation7], %s595_s13, %s595_s13, %s596_s14  }
  0x14   :  { %s521_s19 = scalar_lea.hbm %s719_s0, 128 }
  0x15   :  { %p522_p8 = scmp.ne.s32.totalorder %s719_s0, %s521_s19  ;;  %p525_p9 = scmp.lt.u32.totalorder %s521_s19, %s719_s0 }
  0x17   :  { %p527_p10 = pnand %p525_p9, %p522_p8 }
  0x19   :  { %530 = shalt.err (!%p527_p10)
}
  0x1a   :  { %s531_s24 = scalar_lea.vmem %s643_s27, 128  ;;  %p536_p12 = scmp.lt.s32.totalorder %s643_s27, %s643_s27 }
  0x1b   :  { %p532_p11 = scmp.ne.s32.totalorder %s643_s27, %s531_s24  ;;  %p537_p13 = scmp.lt.s32.totalorder %s531_s24, %s531_s24 }
  0x1d   :  { %p538_p0 = por %p537_p13, %p536_p12 }
  0x1f   :  { %p539_p1 = pnand %p538_p0, %p532_p11 }
  0x21   :  { %542 = shalt.err (!%p539_p1)
}
  0x22   :  { %26 = dma.hbm_to_vmem [thread:$0]  %s719_s0, 128, %s643_s27, [#allocation4], %s595_s13, %s595_s13, %s596_s14  }
  0x23   :  { %s597_s26 = smov [#allocation8]   ;;  %s543_s8 = scalar_lea.hbm %s722_s3, 1024 }
  0x24   :  { %s46_s28 = sshll.u32 %s597_s26, 4  ;;  %p544_p2 = scmp.ne.s32.totalorder %s722_s3, %s543_s8  ;;  %s47_s28 = int_to_ptr.vmem [resolvable:$true] %s46_s28 }
  0x25   :  { %p547_p3 = scmp.lt.u32.totalorder %s543_s8, %s722_s3 }
  0x27   :  { %p549_p4 = pnand %p547_p3, %p544_p2 }
  0x29   :  { %552 = shalt.err (!%p549_p4)
}
  0x2a   :  { %s553_s15 = scalar_lea.vmem %s47_s28, 1024  ;;  %p558_p6 = scmp.lt.s32.totalorder %s47_s28, %s47_s28 }
  0x2b   :  { %p554_p5 = scmp.ne.s32.totalorder %s47_s28, %s553_s15  ;;  %p559_p7 = scmp.lt.s32.totalorder %s553_s15, %s553_s15 }
  0x2d   :  { %p560_p8 = por %p559_p7, %p558_p6 }
  0x2f   :  { %p561_p9 = pnand %p560_p8, %p554_p5 }
  0x31   :  { %564 = shalt.err (!%p561_p9)
}
  0x32   :  { %52 = dma.hbm_to_vmem [thread:$0]  %s722_s3, 1024, %s47_s28, [#allocation7], %s595_s13, %s595_s13, %s596_s14  }
  0x33   :  { %587 = dma.done.wait [#allocation4], 128  }
  0x34   :  { %588 = vsyncadd [#allocation4], 4294967168 }
  0x35   :  { %589 = dma.done.wait [#allocation7], 2048  }
  0x36   :  { %590 = vsyncadd [#allocation7], 4294965248  ;;  %v598_v0 = vmov 0.0   ;;  %vm599_vm0 = vmmov 0   ;;  %v478_v1 = vld [vmem:[#allocation6] sm:$0xff]   ;;  %v479_v2 = vld [vmem:[#allocation6 + $0x8] sm:$0xff]   ;;  %v330_v35 = vlaneseq }
  0x37   :  { %428 = vmatprep.subr.bf16.mxu0 %v598_v0  ;;  %444 = vmatprep.mubr.msk.bf16.mxu0 %vm599_vm0, %v598_v0  ;;  %v480_v3 = vld [vmem:[#allocation6 + $0x10] sm:$0xff]   ;;  %v487_v4 = vld [vmem:[#allocation8] sm:$0xff]   ;;  %v481_v5 = vld [vmem:[#allocation6 + $0x18] sm:$0xff]   ;;  %s600_s19 = smov [#allocation9]  }
  0x38   :  { %448 = vmatprep.subr.bf16.mxu1 %v598_v0  ;;  %464 = vmatprep.mubr.msk.bf16.mxu1 %vm599_vm0, %v598_v0  ;;  %v488_v6 = vld [vmem:[#allocation8 + $0x8] sm:$0xff]   ;;  %v482_v7 = vld [vmem:[#allocation6 + $0x20] sm:$0xff]   ;;  %v489_v8 = vld [vmem:[#allocation8 + $0x10] sm:$0xff]   ;;  %v331_v36 = vand.u32 127, %v330_v35  ;;  %s376_s20 = sshll.u32 %s600_s19, 4  ;;  %s377_s20 = int_to_ptr.vmem [resolvable:$true] %s376_s20 }
  0x39   :  { %429 = vmatpush3.bf16.msra.mxu0 %v478_v1  ;;  %449 = vmatpush3.bf16.msra.mxu1 %v487_v4  ;;  %v483_v9 = vld [vmem:[#allocation6 + $0x28] sm:$0xff]   ;;  %v490_v10 = vld [vmem:[#allocation8 + $0x18] sm:$0xff]   ;;  %v484_v11 = vld [vmem:[#allocation6 + $0x30] sm:$0xff]   ;;  %s565_s21 = scalar_lea.vmem %s377_s20, 256  ;;  %p570_p11 = scmp.lt.s32.totalorder %s377_s20, %s377_s20 }
  0x3a   :  { %430 = vmatprep.subr.bf16.mxu0 %v598_v0  ;;  %450 = vmatprep.subr.bf16.mxu1 %v598_v0  ;;  %v491_v12 = vld [vmem:[#allocation8 + $0x20] sm:$0xff]   ;;  %v485_v13 = vld [vmem:[#allocation6 + $0x38] sm:$0xff]   ;;  %v492_v14 = vld [vmem:[#allocation8 + $0x28] sm:$0xff]   ;;  %vm332_vm1 = vcmp.lt.s32.totalorder %v331_v36, 32  ;;  %p566_p10 = scmp.ne.s32.totalorder %s377_s20, %s565_s21  ;;  %p571_p12 = scmp.lt.s32.totalorder %s565_s21, %s565_s21 }
  0x3b   :  { %v486_v15 = vld [vmem:[#allocation3] sm:$0xff]   ;;  %v493_v16 = vld [vmem:[#allocation8 + $0x30] sm:$0xff]  }
  0x3c   :  { %v494_v17 = vld [vmem:[#allocation8 + $0x38] sm:$0xff]   ;;  %p572_p13 = por %p571_p12, %p570_p11 }
  0x3d   :  { %431 = vmatpush3.bf16.msra.mxu0 %v479_v2  ;;  %451 = vmatpush3.bf16.msra.mxu1 %v488_v6  ;;  %v389_v18 = vld [vmem:[%s721_s2] ss:$0 sm:$0xff] }
  0x3e   :  { %432 = vmatprep.subr.bf16.mxu0 %v598_v0  ;;  %452 = vmatprep.subr.bf16.mxu1 %v598_v0  ;;  %v407_v28 = vld [vmem:[%s723_s4] ss:$0 sm:$0xff]  ;;  %p573_p0 = pnand %p572_p13, %p566_p10 }
  0x3f   :  { %v408_v54 = vld [vmem:[%s724_s5] ss:$0 sm:$0xff] }
  0x40   :  { %v409_v56 = vld [vmem:[%s725_s6] ss:$0 sm:$0xff] }
  0x41   :  { %433 = vmatpush3.bf16.msra.mxu0 %v480_v3  ;;  %453 = vmatpush3.bf16.msra.mxu1 %v489_v8 }
  0x42   :  { %434 = vmatprep.subr.bf16.mxu0 %v598_v0  ;;  %454 = vmatprep.subr.bf16.mxu1 %v598_v0 }
  0x45   :  { %435 = vmatpush3.bf16.msra.mxu0 %v481_v5  ;;  %455 = vmatpush3.bf16.msra.mxu1 %v490_v10 }
  0x46   :  { %436 = vmatprep.subr.bf16.mxu0 %v598_v0  ;;  %456 = vmatprep.subr.bf16.mxu1 %v598_v0 }
  0x49   :  { %437 = vmatpush3.bf16.msra.mxu0 %v482_v7  ;;  %457 = vmatpush3.bf16.msra.mxu1 %v491_v12 }
  0x4a   :  { %438 = vmatprep.subr.bf16.mxu0 %v598_v0  ;;  %458 = vmatprep.subr.bf16.mxu1 %v598_v0 }
  0x4d   :  { %439 = vmatpush3.bf16.msra.mxu0 %v483_v9  ;;  %459 = vmatpush3.bf16.msra.mxu1 %v492_v14 }
  0x4e   :  { %440 = vmatprep.subr.bf16.mxu0 %v598_v0  ;;  %460 = vmatprep.subr.bf16.mxu1 %v598_v0 }
  0x51   :  { %441 = vmatpush3.bf16.msra.mxu0 %v484_v11  ;;  %461 = vmatpush3.bf16.msra.mxu1 %v493_v16 }
  0x52   :  { %442 = vmatprep.subr.bf16.mxu0 %v598_v0  ;;  %462 = vmatprep.subr.bf16.mxu1 %v598_v0 }
  0x55   :  { %443 = vmatpush3.bf16.msra.mxu0 %v485_v13  ;;  %463 = vmatpush3.bf16.msra.mxu1 %v494_v17 }
  0x58   :  { %445 = vmatmul.mubr.bf16.vlgmr.msra.gmra.mrb[0].mxu0 %v486_v15 }
 0x12b   :  { %v188_v19 = vpop.f32.mrb[0].mxu0 }
 0x12c   :  { %v189_v20 = vadd.f32 %v389_v18, %v188_v19  ;;  %v446_v21 = vpop.f32.mrb[1].mxu0 }
 0x12d   :  { %v191_v22 = vpop.f32.mrb[2].mxu0 }
 0x12e   :  { %v192_v23 = vadd.f32 %v389_v18, %v191_v22  ;;  %v447_v24 = vpop.f32.mrb[3].mxu0  ;;  %v195_v25 = vmax.f32 %v189_v20, 0.0 }
 0x130   :  { %v196_v26 = vmax.f32 %v192_v23, 0.0 }
 0x132   :  { %v199_v27 = vpack.c.bf16 %v196_v26, %v195_v25 }
 0x134   :  { %465 = vmatmul.mubr.bf16.vlgmr.msra.gmra.mrb[0].mxu1 %v199_v27 }
 0x207   :  { %v298_v29 = vpop.f32.mrb[0].mxu1 }
 0x208   :  { %v321_v30 = vadd.f32 %v407_v28, %v298_v29  ;;  %v466_v31 = vpop.f32.mrb[1].mxu1 }
 0x209   :  { %v301_v32 = vpop.f32.mrb[2].mxu1 }
 0x20a   :  { %323 = vadd.xlane.f32.xlu0 %v321_v30  ;;  %v467_v33 = vpop.f32.mrb[3].mxu1  ;;  %v322_v34 = vadd.f32 %v407_v28, %v301_v32 }
 0x20e   :  { %325 = vadd.xlane.f32.xlu0 %v322_v34 }
 0x297   :  { %v324_v37 = vpop.xlane.xlu0 %323 }
 0x298   :  { %v328_v38 = vmul.f32 0.03125, %v324_v37 }
 0x29a   :  { %v333_v39 = vsub.f32 %v321_v30, %v328_v38 }
 0x29b   :  { %v326_v40 = vpop.xlane.xlu0 %325 }
 0x29c   :  { %v329_v41 = vmul.f32 0.03125, %v326_v40  ;;  %v335_v42 = vsel %vm332_vm1, %v333_v39, 0.0 }
 0x29d   :  { %v337_v43 = vmul.f32 %v335_v42, %v335_v42 }
 0x29e   :  { %v334_v44 = vsub.f32 %v322_v34, %v329_v41 }
 0x29f   :  { %339 = vadd.xlane.f32.xlu1 %v337_v43 }
 0x2a0   :  { %v336_v45 = vsel %vm332_vm1, %v334_v44, 0.0 }
 0x2a1   :  { %v338_v46 = vmul.f32 %v336_v45, %v336_v45 }
 0x2a3   :  { %341 = vadd.xlane.f32.xlu1 %v338_v46 }
 0x32c   :  { %v340_v47 = vpop.xlane.xlu1 %339 }
 0x32d   :  { %v343_v48 = vmul.f32 0.03125, %v340_v47 }
 0x32f   :  { %v345_v49 = vadd.f32 1e-05, %v343_v48 }
 0x330   :  { %v342_v50 = vpop.xlane.xlu1 %341 }
 0x331   :  { %495 = vrsqrt.f32 %v345_v49  ;;  %v344_v51 = vmul.f32 0.03125, %v342_v50 }
 0x333   :  { %v346_v52 = vadd.f32 1e-05, %v344_v51 }
 0x335   :  { %497 = vrsqrt.f32 %v346_v52 }
 0x33b   :  { %v496_v53 = vpop.eup %495 }
 0x33c   :  { %v349_v55 = vmul.f32 %v496_v53, %v335_v42 }
 0x33e   :  { %v358_v57 = vmul.f32 %v408_v54, %v349_v55 }
 0x33f   :  { %v498_v58 = vpop.eup %497 }
 0x340   :  { %v350_v59 = vmul.f32 %v498_v58, %v336_v45  ;;  %v367_v60 = vadd.f32 %v409_v56, %v358_v57 }
 0x342   :  { %v359_v61 = vmul.f32 %v408_v54, %v350_v59  ;;  %369 = vst [vmem:[#allocation9] sm:$0xff] %v367_v60 }
 0x344   :  { %v368_v62 = vadd.f32 %v409_v56, %v359_v61 }
 0x346   :  { %370 = vst [vmem:[#allocation9 + $0x8] sm:$0xff] %v368_v62 }
 0x347   :  { %576 = shalt.err (!%p573_p0)
}
 0x348   :  { %s577_s22 = scalar_lea.hbm %s726_s7, 256 }
 0x349   :  { %p578_p1 = scmp.ne.s32.totalorder %s726_s7, %s577_s22  ;;  %p581_p2 = scmp.lt.u32.totalorder %s577_s22, %s726_s7 }
 0x34b   :  { %p583_p3 = pnand %p581_p2, %p578_p1 }
 0x34d   :  { %586 = shalt.err (!%p583_p3)
}
 0x34e   :  { %s601_s26 = smov 128   ;;  %s602_s28 = smov 8  }
 0x34f   :  { %382 = dma.vmem_to_hbm [thread:$0]  %s377_s20, 256, %s726_s7, [#allocation5], %s601_s26, %s601_s26, %s602_s28  }
 0x350   :  { %591 = dma.done.wait [#allocation5], 256  }
 0x351   :  { %592 = vsyncadd [#allocation5], 4294967040 }
 0x352   :  { %386 = vsyncpa [#allocation4], 1 }
 0x353   :  { %387 = vsyncpa [#allocation7], 1 }
 0x354   :  { %388 = vsyncpa [#allocation5], 1 }

</bundles_post_ra>
